<compile_context>
chip_gen: v7x
topology: tpu7x:2x2x1
jax: 0.10.0
libtpu: 0.0.40
codegen_flags: <defaults>
</compile_context>

<pallas_src>
import functools

import jax
import jax.numpy as jnp
from jax.experimental import pallas as pl
from jax.experimental.pallas import tpu as pltpu


def _round_up(x, m):
    return (x + m - 1) // m * m


def _cdiv(a, b):
    return (a + b - 1) // b


def _make_squash_kernel(d):
    # d divides 128 => d is a power of two, so i // d is a right shift.
    shift = d.bit_length() - 1

    def kernel(x_ref, o_ref):
        # x_ref: (block_rows, 128) lane-dense tile; each 128-lane row holds
        #        128 // d whole capsules laid out contiguously.
        x = x_ref[...].astype(jnp.float32)
        # bf16 squared values: single bf16 MXU pass (f32 accumulate) keeps the
        # segmented reduce negligible vs. HBM time on v5e and v7x.
        y = (x * x).astype(jnp.bfloat16)
        # Block-diagonal ones matrix seg[i, j] = (i // d == j // d), built
        # in-register from iota + shifts (cheap VPU work, no extra input).
        row = jax.lax.broadcasted_iota(jnp.int32, (128, 128), 0)
        col = jax.lax.broadcasted_iota(jnp.int32, (128, 128), 1)
        seg = ((row >> shift) == (col >> shift)).astype(jnp.bfloat16)
        # Per-capsule ||s||^2, reduced over each d-lane segment and broadcast
        # back across it, in a single MXU matmul.
        sq = jnp.dot(y, seg, preferred_element_type=jnp.float32)
        # squash: ||s||^2/(1+||s||^2) * 1/||s|| == sqrt(||s||^2)/(1+||s||^2)
        # sqrt + approx reciprocal both hit the EUP; exactly 0 for a zero capsule.
        factor = jnp.sqrt(sq) * pl.reciprocal(1.0 + sq, approx=True)
        o_ref[...] = (factor * x).astype(o_ref.dtype)

    return kernel


@functools.partial(jax.jit, static_argnames=("target_block_rows",))
def base_capsule_layer_forward(inx, *, target_block_rows=8192):
    """Squash each capsule vector (last dim) of `inx`.

    inx: [batch, num_capsules, out_dim] float array, out_dim must divide 128.
    Returns an array of the same shape/dtype.
    """
    b, n, d = inx.shape
    if 128 % d != 0:
        raise ValueError("out_dim must divide 128 for lane-dense packing")

    total = b * n * d
    r_packed = _cdiv(total, 128)
    padded_total = r_packed * 128

    flat = inx.reshape(total)
    if padded_total != total:
        # Only for 128-lane packing alignment; pads whole zero capsules
        # (squash(0) == 0) which are sliced off again below.  Skipped entirely
        # in the common total % 128 == 0 case, keeping the kernel at exactly
        # one HBM read + one HBM write.
        flat = jnp.pad(flat, (0, padded_total - total))
    xp = flat.reshape(r_packed, 128)  # free contiguous reshape under jit

    # Block rows: as large as possible up to the target (multiple of 8 so the
    # (8,128) tiling rule holds even for a partial final block); force >= 2
    # grid steps when there is enough work so v7x megacore uses both cores.
    if r_packed <= 8:
        block_rows = r_packed            # single full-array block (exempt rule)
    else:
        block_rows = min(target_block_rows, _round_up(r_packed, 8))
        if _cdiv(r_packed, block_rows) < 2:
            block_rows = _round_up(_cdiv(r_packed, 2), 8)
    grid = (_cdiv(r_packed, block_rows),)

    itemsize = jnp.dtype(inx.dtype).itemsize
    cost = pl.CostEstimate(
        flops=2 * r_packed * 128 * 128,        # segmented-reduce matmul
        transcendentals=2 * r_packed * 128,    # sqrt + approx reciprocal
        bytes_accessed=2 * r_packed * 128 * itemsize,
    )

    out_p = pl.pallas_call(
        _make_squash_kernel(d),
        out_shape=jax.ShapeDtypeStruct((r_packed, 128), inx.dtype),
        grid_spec=pltpu.PrefetchScalarGridSpec(
            num_scalar_prefetch=0,
            grid=grid,
            in_specs=[pl.BlockSpec((block_rows, 128), lambda i: (i, 0))],
            out_specs=pl.BlockSpec((block_rows, 128), lambda i: (i, 0)),
        ),
        compiler_params=pltpu.CompilerParams(
            dimension_semantics=("parallel",),
            vmem_limit_bytes=32 * 1024 * 1024,
        ),
        cost_estimate=cost,
    )(xp)

    out_flat = out_p.reshape(padded_total)
    if padded_total != total:
        out_flat = out_flat[:total]
    return out_flat.reshape(b, n, d)


def _squash_ref(inx):
    x = inx.astype(jnp.float32)
    sq = jnp.sum(x * x, axis=-1, keepdims=True)
    factor = jnp.sqrt(sq) / (1.0 + sq)
    return (factor * x).astype(inx.dtype)


if __name__ == "__main__":
    # Small capsule-shaped input: batch=2, num_capsules=64, out_dim=32.
    key = jax.random.PRNGKey(0)
    x = jax.random.normal(key, (2, 64, 32), dtype=jnp.float32)

    out = base_capsule_layer_forward(x)
    out = jax.block_until_ready(out)

    ref = _squash_ref(x)
    assert out.shape == x.shape and out.dtype == x.dtype
    # Tolerance covers the bf16 MXU segmented reduce + EUP approximate reciprocal.
    assert jnp.allclose(out, ref, atol=1e-2, rtol=1e-2), "mismatch vs reference"

    print("KERNEL_OK")
</pallas_src>

<mosaic_0001>
module attributes {stable_mosaic.version = 11 : i64} {
  func.func @kernel(%arg0: i32, %arg1: memref<16x128xf32, #tpu.memory_space<vmem>>, %arg2: memref<16x128xf32, #tpu.memory_space<vmem>>) attributes {dimension_semantics = [#tpu.dimension_semantics<parallel>], iteration_bounds = array<i64: 2>, scalar_prefetch = 0 : i64, scratch_operands = 0 : i64, tpu.core_type = #tpu.core_type<tc>, window_params = [{transform_indices = @transform_0, window_bounds = array<i64: 16, 128>}, {transform_indices = @transform_1, window_bounds = array<i64: 16, 128>}]} {
    %c0 = arith.constant 0 : index
    %c0_0 = arith.constant 0 : index
    %0 = vector.load %arg1[%c0, %c0_0] : memref<16x128xf32, #tpu.memory_space<vmem>>, vector<16x128xf32>
    %1 = arith.mulf %0, %0 : vector<16x128xf32>
    %2 = arith.truncf %1 : vector<16x128xf32> to vector<16x128xbf16>
    %3 = tpu.iota {dimensions = array<i32: 0>} : vector<128x128xi32>
    %4 = tpu.iota {dimensions = array<i32: 1>} : vector<128x128xi32>
    %c5_i32 = arith.constant 5 : i32
    %5 = vector.broadcast %c5_i32 : i32 to vector<128x128xi32>
    %6 = arith.shrsi %3, %5 : vector<128x128xi32>
    %c5_i32_1 = arith.constant 5 : i32
    %7 = vector.broadcast %c5_i32_1 : i32 to vector<128x128xi32>
    %8 = arith.shrsi %4, %7 : vector<128x128xi32>
    %9 = arith.cmpi eq, %6, %8 : vector<128x128xi32>
    %10 = arith.extui %9 : vector<128x128xi1> to vector<128x128xi32>
    %11 = arith.sitofp %10 : vector<128x128xi32> to vector<128x128xf32>
    %12 = arith.truncf %11 : vector<128x128xf32> to vector<128x128xbf16>
    %cst = arith.constant dense<0.000000e+00> : vector<16x128xf32>
    %13 = tpu.matmul %2, %12, %cst {dimension_numbers = #tpu.dot_dimension_numbers<[1], [0], [0], [1], [0, 0, 1, 1], [], []>} : vector<16x128xbf16>, vector<128x128xbf16>, vector<16x128xf32> -> vector<16x128xf32>
    %14 = math.sqrt %13 : vector<16x128xf32>
    %cst_2 = arith.constant 1.000000e+00 : f32
    %15 = vector.broadcast %cst_2 : f32 to vector<16x128xf32>
    %16 = arith.addf %15, %13 : vector<16x128xf32>
    %17 = tpu.reciprocal %16 {approx = true} : vector<16x128xf32> -> vector<16x128xf32>
    %18 = arith.mulf %14, %17 : vector<16x128xf32>
    %19 = arith.mulf %18, %0 : vector<16x128xf32>
    %c0_3 = arith.constant 0 : index
    %c0_4 = arith.constant 0 : index
    %20 = vector.load %arg2[%c0_3, %c0_4] : memref<16x128xf32, #tpu.memory_space<vmem>>, vector<16x128xf32>
    tpu.vector_store %arg2[%c0_3, %c0_4], %19 {strides = array<i32>} : memref<16x128xf32, #tpu.memory_space<vmem>>, vector<16x128xf32>,
    return
  }
  func.func @transform_0(%arg0: i32) -> (i32, i32) {
    %c0_i32 = arith.constant 0 : i32
    %c0_i32_0 = arith.constant 0 : i32
    return %arg0, %c0_i32 : i32, i32
  }
  func.func @transform_1(%arg0: i32) -> (i32, i32) {
    %c0_i32 = arith.constant 0 : i32
    %c0_i32_0 = arith.constant 0 : i32
    return %arg0, %c0_i32 : i32, i32
  }
}

</mosaic_0001>

<bundles_post_ra>
// kernel: base_capsule_layer_forward.1
= control target key start
LH: loop header
LB: loop body
LE: loop exit
PB: predicated region body
PF: predicated region fallthrough
CT: control target
= control target key end

     0   :  { %s451_s6 = smov 0   ;;  %s534_s0 = inlined_call_operand.vmem [shape: f32[32,128], index: 0, kind: input, shape index: {}]   ;;  %s535_s1 = inlined_call_operand.vmem [shape: f32[32,128], index: 1, kind: output, shape index: {}]  }
   0x1 LB: > { %s339_s7 = sadd.s32 4294967295, %s436_s6   ;;  %p343_p0 = scmp.ge.s32.totalorder %s436_s6, 1  ;;  %s436_s6 = sphi %s451_s6, %s11_s6  }
   0x2   : > { %p88_p1 = scmp.lt.s32.totalorder %s436_s6, 3 }
   0x4   : > { %p89_p2 = pnand %p343_p0, %p88_p1 }
   0x5   : > { %v126_v0 = vlaneseq (!%p89_p2)  ;;  %v438_v1 = vmov (!%p89_p2), 0.0   ;;  %vm439_vm0 = vmmov (!%p89_p2), 0   ;;  %v440_v19 = vmov (!%p89_p2), 1.0|1.0   ;;  %s344_s8 = sshll.u32 (!%p89_p2), %s339_s7, 1 }
   0x6   : > { %92 = sbr.rel (%p89_p2) target bundleno = 280 (0x118), region = 24  ;;  %391 = vmatprep.subr.bf16.mxu0 (!%p89_p2), %v438_v1  ;;  %407 = vmatprep.mubr.msk.bf16.mxu0 (!%p89_p2), %vm439_vm0, %v438_v1  ;;  %p109_p3 = scmp.lt.s32.totalorder (!%p89_p2), %s344_s8, 3 }
   0x7   : > { %v127_v2 = vshrl.u32 (!%p89_p2), %v126_v0, 7  ;;  %v144_v3 = vand.u32 (!%p89_p2), 127, %v126_v0 }
   0x9   : > { %v128_v4 = vadd.s32 (!%p89_p2), 8, %v127_v2  ;;  %v145_v5 = vshra.s32 (!%p89_p2), %v127_v2, 5  ;;  %v461_v6 = vshra.s32 (!%p89_p2), %v144_v3, 5  ;;  %v129_v7 = vadd.s32 (!%p89_p2), 16, %v127_v2 }
   0xa   : > { %v130_v8 = vadd.s32 (!%p89_p2), 24, %v127_v2  ;;  %v131_v9 = vadd.s32 (!%p89_p2), 32, %v127_v2  ;;  %v132_v10 = vadd.s32 (!%p89_p2), 40, %v127_v2  ;;  %v133_v14 = vadd.s32 (!%p89_p2), 48, %v127_v2 }
   0xb   : > { %v146_v11 = vshra.s32 (!%p89_p2), %v128_v4, 5  ;;  %vm162_vm1 = vcmp.eq.s32.totalorder (!%p89_p2), %v145_v5, %v461_v6  ;;  %v147_v12 = vshra.s32 (!%p89_p2), %v129_v7, 5  ;;  %v134_v15 = vadd.s32 (!%p89_p2), 56, %v127_v2 }
   0xc   : > { %v148_v13 = vshra.s32 (!%p89_p2), %v130_v8, 5  ;;  %v149_v17 = vshra.s32 (!%p89_p2), %v131_v9, 5  ;;  %v150_v18 = vshra.s32 (!%p89_p2), %v132_v10, 5  ;;  %v151_v20 = vshra.s32 (!%p89_p2), %v133_v14, 5 }
   0xd   : > { %vm163_vm2 = vcmp.eq.s32.totalorder %v146_v11, %v461_v6  ;;  %vm466_vm3 = vcmp.eq.s32.totalorder %v147_v12, %v461_v6  ;;  %v152_v21 = vshra.s32 %v134_v15, 5  ;;  %v135_v23 = vadd.s32 64, %v127_v2  ;;  %s547_s8 = smov (!%p109_p3, %s344_s8), 3 }
   0xe   : > { %vm364_vm4 = vmpackc.low %vm163_vm2, %vm162_vm1  ;;  %vm165_vm5 = vcmp.eq.s32.totalorder %v148_v13, %v461_v6  ;;  %vm475_vm7 = vcmp.eq.s32.totalorder %v149_v17, %v461_v6  ;;  %vm167_vm8 = vcmp.eq.s32.totalorder %v150_v18, %v461_v6  ;;  %v136_v24 = vadd.s32 72, %v127_v2  ;;  %s345_s9 = sshll.u32 %s547_s8, 3 }
   0xf   : > { %392 = vmatpush3.bf16.msk.msra.mxu0 %vm364_vm4, %v440_v19  ;;  %vm366_vm6 = vmpackc.low %vm165_vm5, %vm466_vm3  ;;  %vm486_vm10 = vcmp.eq.s32.totalorder %v151_v20, %v461_v6  ;;  %vm491_vm11 = vcmp.eq.s32.totalorder %v152_v21, %v461_v6  ;;  %v153_v27 = vshra.s32 %v135_v23, 5  ;;  %v137_v29 = vadd.s32 80, %v127_v2  ;;  %s112_s12 = scalar_lea.vmem %s534_s0, %s345_s9  ;;  %s118_s15 = scalar_lea.vmem %s535_s1, %s345_s9 }
  0x10   : > { %393 = vmatprep.subr.bf16.mxu0 %v438_v1  ;;  %vm368_vm9 = vmpackc.low %vm167_vm8, %vm475_vm7  ;;  %v154_v28 = vshra.s32 %v136_v24, 5  ;;  %v138_v30 = vadd.s32 88, %v127_v2  ;;  %v139_v31 = vadd.s32 96, %v127_v2  ;;  %v140_v32 = vadd.s32 104, %v127_v2  ;;  %v121_v42 = vld [vmem:[%s112_s12] sm:$0xff]  ;;  %v122_v43 = vld [vmem:[%s112_s12 + $0x8] sm:$0xff] }
  0x11   : > { %vm370_vm12 = vmpackc.low %vm491_vm11, %vm486_vm10  ;;  %vm501_vm13 = vcmp.eq.s32.totalorder %v153_v27, %v461_v6  ;;  %v155_v34 = vshra.s32 %v137_v29, 5  ;;  %v141_v36 = vadd.s32 112, %v127_v2  ;;  %v142_v37 = vadd.s32 120, %v127_v2 }
  0x12   : > { %vm171_vm14 = vcmp.eq.s32.totalorder %v154_v28, %v461_v6  ;;  %v156_v35 = vshra.s32 %v138_v30, 5  ;;  %v157_v38 = vshra.s32 %v139_v31, 5  ;;  %v158_v39 = vshra.s32 %v140_v32, 5 }
  0x13   : > { %394 = vmatpush3.bf16.msk.msra.mxu0 %vm366_vm6, %v440_v19  ;;  %vm372_vm15 = vmpackc.low %vm171_vm14, %vm501_vm13  ;;  %vm172_vm0 = vcmp.eq.s32.totalorder %v155_v34, %v461_v6  ;;  %v159_v40 = vshra.s32 %v141_v36, 5  ;;  %v160_v41 = vshra.s32 %v142_v37, 5  ;;  %v123_v44 = vmul.f32 %v121_v42, %v121_v42 }
  0x14   : > { %395 = vmatprep.subr.bf16.mxu0 %v438_v1  ;;  %vm173_vm1 = vcmp.eq.s32.totalorder %v156_v35, %v461_v6  ;;  %vm174_vm3 = vcmp.eq.s32.totalorder %v157_v38, %v461_v6  ;;  %vm175_vm4 = vcmp.eq.s32.totalorder %v158_v39, %v461_v6  ;;  %v124_v45 = vmul.f32 %v122_v43, %v122_v43 }
  0x15   : > { %vm374_vm2 = vmpackc.low %vm173_vm1, %vm172_vm0  ;;  %vm176_vm6 = vcmp.eq.s32.totalorder %v159_v40, %v461_v6  ;;  %vm177_vm7 = vcmp.eq.s32.totalorder %v160_v41, %v461_v6 }
  0x16   : > { %vm376_vm5 = vmpackc.low %vm175_vm4, %vm174_vm3  ;;  %v125_v46 = vpack.c.bf16 %v124_v45, %v123_v44 }
  0x17   : > { %396 = vmatpush3.bf16.msk.msra.mxu0 %vm368_vm9, %v440_v19  ;;  %vm378_vm8 = vmpackc.low %vm177_vm7, %vm176_vm6 }
  0x18   : > { %397 = vmatprep.subr.bf16.mxu0 %v438_v1 }
  0x1b   : > { %398 = vmatpush3.bf16.msk.msra.mxu0 %vm370_vm12, %v440_v19 }
  0x1c   : > { %399 = vmatprep.subr.bf16.mxu0 %v438_v1 }
  0x1f   : > { %400 = vmatpush3.bf16.msk.msra.mxu0 %vm372_vm15, %v440_v19 }
  0x20   : > { %401 = vmatprep.subr.bf16.mxu0 %v438_v1 }
  0x23   : > { %402 = vmatpush3.bf16.msk.msra.mxu0 %vm374_vm2, %v440_v19 }
  0x24   : > { %403 = vmatprep.subr.bf16.mxu0 %v438_v1 }
  0x27   : > { %404 = vmatpush3.bf16.msk.msra.mxu0 %vm376_vm5, %v440_v19 }
  0x28   : > { %405 = vmatprep.subr.bf16.mxu0 %v438_v1 }
  0x2b   : > { %406 = vmatpush3.bf16.msk.msra.mxu0 %vm378_vm8, %v440_v19 }
  0x2e   : > { %408 = vmatmul.mubr.bf16.vlgmr.msra.gmra.mrb[0].mxu0 %v125_v46 }
 0x101   : > { %v252_v47 = vpop.f32.mrb[0].mxu0 }
 0x102   : > { %422 = vrsqrt.f32 %v252_v47  ;;  %v409_v48 = vpop.f32.mrb[1].mxu0  ;;  %v273_v49 = vadd.f32 1.0, %v252_v47  ;;  %vm261_vm9 = vcmp.eq.f32.partialorder %v252_v47, inf  ;;  %v264_v56 = vand.u32 2147483648, %v252_v47 }
 0x103   : > { %v255_v50 = vpop.f32.mrb[2].mxu0  ;;  %vm263_vm10 = vcmp.eq.f32.partialorder %v252_v47, 0.0 }
 0x104   : > { %424 = vrsqrt.f32 %v255_v50  ;;  %v410_v51 = vpop.f32.mrb[3].mxu0  ;;  %v274_v52 = vadd.f32 1.0, %v255_v50  ;;  %vm268_vm11 = vcmp.eq.f32.partialorder %v255_v50, inf  ;;  %v271_v61 = vand.u32 2147483648, %v255_v50 }
 0x105   : > { %426 = vrcp.f32 %v273_v49  ;;  %vm270_vm12 = vcmp.eq.f32.partialorder %v255_v50, 0.0 }
 0x106   : > { %428 = vrcp.f32 %v274_v52 }
 0x10c   : > { %v423_v53 = vpop.eup %422 }
 0x10d   : > { %v260_v54 = vmul.f32 %v423_v53, %v252_v47 }
 0x10e   : > { %v425_v55 = vpop.eup %424 }
 0x10f   : > { %v262_v57 = vsel %vm261_vm9, %v252_v47, %v260_v54  ;;  %v267_v58 = vmul.f32 %v425_v55, %v255_v50  ;;  %v427_v59 = vpop.eup %426 }
 0x110   : > { %v265_v60 = vsel %vm263_vm10, %v264_v56, %v262_v57  ;;  %v429_v0 = vpop.eup %428 }
 0x111   : > { %v277_v62 = vmul.f32 %v427_v59, %v265_v60  ;;  %v269_v63 = vsel %vm268_vm11, %v255_v50, %v267_v58 }
 0x112   : > { %v272_v1 = vsel %vm270_vm12, %v271_v61, %v269_v63 }
 0x113   : > { %v279_v2 = vmul.f32 %v277_v62, %v121_v42  ;;  %v278_v3 = vmul.f32 %v429_v0, %v272_v1 }
 0x115   : > { %281 = vst [vmem:[%s118_s15] sm:$0xff] %v279_v2  ;;  %v280_v4 = vmul.f32 %v278_v3, %v122_v43 }
 0x117   : > { %282 = vst [vmem:[%s118_s15 + $0x8] sm:$0xff] %v280_v4 }
 0x118 PF: > { %s11_s6 = sadd.s32 1, %s436_s6  }
 0x119   : > { %p8_p4 = scmp.ge.s32.totalorder %s11_s6, 4  }
 0x11b   :  { %10 = sbr.rel (!%p8_p4) target bundleno = 1 (0x1), region = 54 }

</bundles_post_ra>
